<compile_context>
chip_gen: v5e
topology: v5e:2x2
jax: 0.10.0
libtpu: 0.0.40
codegen_flags: <defaults>
</compile_context>

<pallas_src>
import functools

import jax
import jax.numpy as jnp
from jax import lax
from jax.experimental import pallas as pl
from jax.experimental.pallas import tpu as pltpu


def _gcod_kernel(logits_ref, targets_ref, out_ref, acc_ref, *,
                 batch_size, num_classes, q, k, gamma, threshold,
                 label_smoothing, eps):
    C, TB = logits_ref.shape            # classes on sublanes, batch tile on lanes
    c_id = pl.program_id(0)             # logical core (parallel axis)
    i_id = pl.program_id(1)             # tile within this core (arbitrary axis)
    tiles_per_core = pl.num_programs(1)
    kk = min(k, C)

    @pl.when(i_id == 0)
    def _():
        acc_ref[0] = 0.0                # sum of per-sample GCE terms
        acc_ref[1] = 0.0                # sum of smallest-k confidences over noisy samples
        acc_ref[2] = 0.0                # number of noisy samples

    # Valid-lane mask from the *logical* (unclamped) tile index: padded last tiles and
    # clamped duplicate tiles contribute zero.
    lane = lax.broadcasted_iota(jnp.int32, (1, TB), 1)
    tile_idx = c_id * tiles_per_core + i_id
    valid = (tile_idx * TB + lane) < batch_size                   # [1, TB] bool

    # ---- GCE part (softmax over classes = sublane axis) ----------------------
    x = jnp.clip(logits_ref[...].astype(jnp.float32), -15.0, 15.0)
    m = jnp.max(x, axis=0, keepdims=True)                         # [1, TB]
    e = jnp.exp(x - m)
    denom = jnp.sum(e, axis=0, keepdims=True)                     # [1, TB]
    # One exact reciprocal on a single [1,TB] row, then multiplies: removes (C-1)*TB
    # f32 divides per tile while keeping exact-divide accuracy (no approx-recip error).
    inv = 1.0 / denom
    p = jnp.clip(e * inv, eps, 1.0)                               # [C, TB]

    cls = lax.broadcasted_iota(jnp.int32, (C, TB), 0)             # class id per sublane
    tgt = targets_ref[...]                                        # [1, TB] int32
    # Folded label smoothing: prod = (1-ls)*p_target + (ls/C)*sum_p
    # (drops the one_hot / smooth / p*smooth [C,TB] temporaries; the extra sublane
    #  reduce rides the otherwise-idle XLU).
    p_tgt = jnp.sum(jnp.where(cls == tgt, p, 0.0), axis=0, keepdims=True)   # [1, TB]
    p_sum = jnp.sum(p, axis=0, keepdims=True)                               # [1, TB]
    prod = jnp.maximum((1.0 - label_smoothing) * p_tgt
                       + (label_smoothing / num_classes) * p_sum, eps)
    gce = (1.0 - jnp.exp(q * jnp.log(prod))) / q                  # prod ** q, prod > 0
    gce = jnp.where(valid, gce, 0.0)

    # ---- Outlier-detection part -----------------------------------------------
    # sum of k smallest (1 - p) == kk - sum of k largest p; keep first-occurrence
    # tie masking (clip-to-eps creates ties) to match torch.topk / lax.top_k.
    sum_mx = jnp.zeros((1, TB), jnp.float32)
    pw = p
    for j in range(kk):                                           # static, small unroll
        mx = jnp.max(pw, axis=0, keepdims=True)
        sum_mx = sum_mx + mx
        if j + 1 < kk:                                            # last mask is dead work
            first = jnp.min(jnp.where(pw >= mx, cls, C), axis=0, keepdims=True)
            pw = jnp.where(cls == first, -1.0, pw)                # mask 1st occurrence
    conf_sum = kk - sum_mx
    noisy = jnp.logical_and(conf_sum < threshold, valid)

    acc_ref[0] = acc_ref[0] + jnp.sum(gce)
    acc_ref[1] = acc_ref[1] + jnp.sum(jnp.where(noisy, conf_sum, 0.0))
    acc_ref[2] = acc_ref[2] + jnp.sum(jnp.where(noisy, 1.0, 0.0))

    # Emit this core's three partial sums into its (8,128)-aligned output block
    # (lanes 0..2 of every sublane carry the values; wrapper reads sublane 0).
    @pl.when(i_id == tiles_per_core - 1)
    def _():
        lane8 = lax.broadcasted_iota(jnp.int32, out_ref.shape, 1)
        out_ref[...] = jnp.where(lane8 == 0, acc_ref[0],
                       jnp.where(lane8 == 1, acc_ref[1],
                       jnp.where(lane8 == 2, acc_ref[2], 0.0)))


def _auto_tile_b(C, in_bytes, budget_bytes):
    """Largest lane-tile that keeps double-buffered inputs + live f32 temporaries in budget."""
    c_pad = ((max(C, 1) + 7) // 8) * 8
    # 2x double-buffered logits tile + ~6 live [C_pad, TILE_B] f32 temporaries
    # (x, e, p, pw, cls, select masks) + targets/row temporaries.
    per_lane = 2 * c_pad * in_bytes + 6 * c_pad * 4 + 2 * 4 + 64
    tile_b = budget_bytes // per_lane
    return int(max(128, min(65536, (tile_b // 128) * 128)))


def gcod_loss(logits, targets, *, num_classes, q=0.7, k=2, gamma=0.5,
              threshold=0.5, label_smoothing=0.1, eps=1e-7,
              class_major=False, max_tile_b=None, num_cores=2):
    """GCOD loss.  `class_major=True` means logits are already [C, B] (preferred, no copy)."""
    if class_major:
        C, B = logits.shape
        logits_cb = logits                                  # already [C, B], zero-copy
    else:
        B, C = logits.shape
        # TODO(synk): prefer producing logits class-major upstream ([C, B]) — this
        # transpose is a full extra HBM read+write pass that the kernel never needs.
        logits_cb = jnp.transpose(logits)
    assert C == num_classes
    targets_row = targets.astype(jnp.int32).reshape(1, B)

    # --- per-generation VMEM budget & tile selection --------------------------------
    in_bytes = jnp.dtype(logits_cb.dtype).itemsize
    try:
        vmem_cap = int(pltpu.get_tpu_info().vmem_capacity_bytes)
    except Exception:
        vmem_cap = 64 * 1024 * 1024                         # conservative (v7x physical)
    vmem_limit = int(min(vmem_cap * 3 // 4, 96 * 1024 * 1024))   # 96MiB on v5e/v6e, 48MiB on v7x
    tile_budget = vmem_limit * 2 // 3                        # headroom for compiler scratch

    tile_b = _auto_tile_b(C, in_bytes, tile_budget)
    if max_tile_b is not None:
        tile_b = min(tile_b, int(max_tile_b))

    if B <= tile_b:
        TILE_B = B                                           # single tile, full lane dim
        num_tiles = 1
    else:
        TILE_B = max(128, (tile_b // 128) * 128)
        num_tiles = pl.cdiv(B, TILE_B)

    # --- split batch tiles across (up to) 2 TensorCores (v7x); no-op on v5e/v6e -----
    nc = 1 if num_tiles < 2 else max(1, min(num_cores, 2, num_tiles))
    tiles_per_core = pl.cdiv(num_tiles, nc)
    last_tile = num_tiles - 1

    def block_map(c, i):
        # Clamp logical tiles past the end back in-range; the kernel masks them out
        # via the global batch index, so no double counting.
        return (0, jnp.minimum(c * tiles_per_core + i, last_tile))

    kernel = functools.partial(
        _gcod_kernel,
        batch_size=B, num_classes=num_classes, q=q, k=k, gamma=gamma,
        threshold=threshold, label_smoothing=label_smoothing, eps=eps)

    partials = pl.pallas_call(
        kernel,
        out_shape=jax.ShapeDtypeStruct((nc * 8, 128), jnp.float32),
        grid=(nc, tiles_per_core),
        in_specs=[
            pl.BlockSpec((C, TILE_B), block_map),            # logits  [C, B] tile
            pl.BlockSpec((1, TILE_B), block_map),            # targets [1, B] tile
        ],
        out_specs=pl.BlockSpec((8, 128), lambda c, i: (c, 0)),  # per-core partials
        scratch_shapes=[pltpu.SMEM((3,), jnp.float32)],      # gce_sum, outlier_sum, n_noisy
        compiler_params=pltpu.CompilerParams(
            dimension_semantics=("parallel", "arbitrary"),
            vmem_limit_bytes=vmem_limit),
    )(logits_cb, targets_row)

    # --- final (nonlinear) combine of per-core partials in the wrapper ---------------
    part = partials.reshape(nc, 8, 128)[:, 0, :3]            # [nc, 3]
    gce_sum = jnp.sum(part[:, 0])
    out_sum = jnp.sum(part[:, 1])
    n_noisy = jnp.sum(part[:, 2])
    kk = min(k, num_classes)
    gce_loss = gce_sum / B
    outlier_loss = jnp.where(n_noisy > 0.0, out_sum / (n_noisy * kk), 0.0)
    return gce_loss + gamma * outlier_loss

    # TODO(synk): for num_classes in the thousands, add a class-chunk grid axis with an
    # online softmax (running max/denominator) and a running top-2 of p so VMEM stays
    # O(chunk x TILE_B) regardless of C (needed to keep lane-wide tiles on v7x's 64 MiB).


def gcod_loss_ref(logits, targets, *, num_classes, q=0.7, k=2, gamma=0.5,
                  threshold=0.5, label_smoothing=0.1, eps=1e-7):
    """Pure-JAX reference mirroring the PyTorch forward."""
    one_hot = jax.nn.one_hot(targets, num_classes, dtype=jnp.float32)
    smooth = (1 - label_smoothing) * one_hot + label_smoothing / num_classes
    x = jnp.clip(logits.astype(jnp.float32), -15.0, 15.0)
    p = jnp.clip(jax.nn.softmax(x, axis=1), eps, 1.0)
    prod = jnp.clip(jnp.sum(p * smooth, axis=1), eps, None)
    gce = jnp.mean((1.0 - prod ** q) / q)
    conf = 1.0 - p
    kk = min(k, conf.shape[1])
    smallest_k = -jax.lax.top_k(-conf, kk)[0]           # k smallest values per row
    noisy = jnp.sum(smallest_k, axis=1) < threshold
    n = jnp.sum(noisy.astype(jnp.float32))
    o_sum = jnp.sum(jnp.where(noisy[:, None], smallest_k, 0.0))
    outlier = jnp.where(n > 0, o_sum / (n * kk), 0.0)
    return gce + gamma * outlier


if __name__ == "__main__":
    key = jax.random.PRNGKey(0)

    # Small single-tile case.
    B, C = 8, 10
    k_logits, k_targets = jax.random.split(key)
    logits = jax.random.normal(k_logits, (B, C), dtype=jnp.float32) * 3.0
    targets = jax.random.randint(k_targets, (B,), 0, C, dtype=jnp.int32)
    loss = jax.block_until_ready(gcod_loss(logits, targets, num_classes=C))
    ref = gcod_loss_ref(logits, targets, num_classes=C)
    assert jnp.allclose(loss, ref, atol=1e-5, rtol=1e-5), (loss, ref)

    # Multi-tile case exercising the (parallel, arbitrary) grid, tile clamping and
    # padded-lane masking.
    B2 = 300
    k2a, k2b = jax.random.split(jax.random.PRNGKey(1))
    logits2 = jax.random.normal(k2a, (B2, C), dtype=jnp.float32) * 3.0
    targets2 = jax.random.randint(k2b, (B2,), 0, C, dtype=jnp.int32)
    loss2 = jax.block_until_ready(
        gcod_loss(logits2, targets2, num_classes=C, max_tile_b=128))
    ref2 = gcod_loss_ref(logits2, targets2, num_classes=C)
    assert jnp.allclose(loss2, ref2, atol=1e-5, rtol=1e-5), (loss2, ref2)

    # Class-major fast path (producer hands the kernel [C, B]; no wrapper transpose).
    loss3 = jax.block_until_ready(
        gcod_loss(jnp.transpose(logits2), targets2, num_classes=C,
                  class_major=True, max_tile_b=128))
    assert jnp.allclose(loss3, ref2, atol=1e-5, rtol=1e-5), (loss3, ref2)

    print("KERNEL_OK")
</pallas_src>

<mosaic_0001>
module attributes {stable_mosaic.version = 11 : i64} {
  func.func @_gcod_kernel(%arg0: i32, %arg1: i32, %arg2: memref<10x8xf32, #tpu.memory_space<vmem>>, %arg3: memref<1x8xi32, #tpu.memory_space<vmem>>, %arg4: memref<8x128xf32, #tpu.memory_space<vmem>>, %arg5: memref<3xf32, #tpu.memory_space<smem>>) attributes {dimension_semantics = [#tpu.dimension_semantics<parallel>, #tpu.dimension_semantics<arbitrary>], iteration_bounds = array<i64: 1, 1>, scalar_prefetch = 0 : i64, scratch_operands = 1 : i64, tpu.core_type = #tpu.core_type<tc>, window_params = [{transform_indices = @transform_0, window_bounds = array<i64: 10, 8>}, {transform_indices = @transform_1, window_bounds = array<i64: 1, 8>}, {transform_indices = @transform_2, window_bounds = array<i64: 8, 128>}]} {
    %c0_i32 = arith.constant 0 : i32
    %0 = arith.cmpi eq, %arg1, %c0_i32 : i32
    %1 = arith.extui %0 : i1 to i32
    %c0_i32_0 = arith.constant 0 : i32
    %2 = arith.cmpi ne, %1, %c0_i32_0 : i32
    scf.if %2 {
      %cst_40 = arith.constant 0.000000e+00 : f32
      %c0_41 = arith.constant 0 : index
      %109 = memref.load %arg5[%c0_41] : memref<3xf32, #tpu.memory_space<smem>>
      memref.store %cst_40, %arg5[%c0_41] : memref<3xf32, #tpu.memory_space<smem>>
      %cst_42 = arith.constant 0.000000e+00 : f32
      %c1_43 = arith.constant 1 : index
      %110 = memref.load %arg5[%c1_43] : memref<3xf32, #tpu.memory_space<smem>>
      memref.store %cst_42, %arg5[%c1_43] : memref<3xf32, #tpu.memory_space<smem>>
      %cst_44 = arith.constant 0.000000e+00 : f32
      %c2_45 = arith.constant 2 : index
      %111 = memref.load %arg5[%c2_45] : memref<3xf32, #tpu.memory_space<smem>>
      memref.store %cst_44, %arg5[%c2_45] : memref<3xf32, #tpu.memory_space<smem>>
    } else {
    }
    %3 = tpu.iota {dimensions = array<i32: 1>} : vector<1x8xi32>
    %c1_i32 = arith.constant 1 : i32
    %4 = arith.muli %arg0, %c1_i32 : i32
    %5 = arith.addi %4, %arg1 : i32
    %c8_i32 = arith.constant 8 : i32
    %6 = arith.muli %5, %c8_i32 : i32
    %7 = vector.broadcast %6 : i32 to vector<1x8xi32>
    %8 = arith.addi %7, %3 : vector<1x8xi32>
    %c8_i32_1 = arith.constant 8 : i32
    %9 = vector.broadcast %c8_i32_1 : i32 to vector<1x8xi32>
    %10 = arith.cmpi slt, %8, %9 : vector<1x8xi32>
    %c0 = arith.constant 0 : index
    %c0_2 = arith.constant 0 : index
    %11 = vector.load %arg2[%c0, %c0_2] : memref<10x8xf32, #tpu.memory_space<vmem>>, vector<10x8xf32>
    %cst = arith.constant -1.500000e+01 : f32
    %cst_3 = arith.constant 1.500000e+01 : f32
    %12 = vector.broadcast %cst : f32 to vector<10x8xf32>
    %13 = arith.maximumf %12, %11 : vector<10x8xf32>
    %14 = vector.broadcast %cst_3 : f32 to vector<10x8xf32>
    %15 = arith.minimumf %14, %13 : vector<10x8xf32>
    %cst_4 = arith.constant dense<0xFF800000> : vector<8xf32>
    %16 = vector.multi_reduction <maximumf>, %15, %cst_4 [0] : vector<10x8xf32> to vector<8xf32>
    %17 = vector.shape_cast %16 : vector<8xf32> to vector<1x8xf32>
    %18 = vector.broadcast %17 : vector<1x8xf32> to vector<10x8xf32>
    %19 = arith.subf %15, %18 : vector<10x8xf32>
    %20 = math.exp %19 : vector<10x8xf32>
    %cst_5 = arith.constant dense<0.000000e+00> : vector<8xf32>
    %21 = vector.multi_reduction <add>, %20, %cst_5 [0] : vector<10x8xf32> to vector<8xf32>
    %22 = vector.shape_cast %21 : vector<8xf32> to vector<1x8xf32>
    %cst_6 = arith.constant 1.000000e+00 : f32
    %23 = vector.broadcast %cst_6 : f32 to vector<1x8xf32>
    %24 = arith.divf %23, %22 : vector<1x8xf32>
    %25 = vector.broadcast %24 : vector<1x8xf32> to vector<10x8xf32>
    %26 = arith.mulf %20, %25 : vector<10x8xf32>
    %cst_7 = arith.constant 1.000000e-07 : f32
    %cst_8 = arith.constant 1.000000e+00 : f32
    %27 = vector.broadcast %cst_7 : f32 to vector<10x8xf32>
    %28 = arith.maximumf %27, %26 : vector<10x8xf32>
    %29 = vector.broadcast %cst_8 : f32 to vector<10x8xf32>
    %30 = arith.minimumf %29, %28 : vector<10x8xf32>
    %31 = tpu.iota {dimensions = array<i32: 0>} : vector<10x8xi32>
    %c0_9 = arith.constant 0 : index
    %c0_10 = arith.constant 0 : index
    %32 = vector.load %arg3[%c0_9, %c0_10] : memref<1x8xi32, #tpu.memory_space<vmem>>, vector<1x8xi32>
    %33 = vector.broadcast %32 : vector<1x8xi32> to vector<10x8xi32>
    %34 = arith.cmpi eq, %31, %33 : vector<10x8xi32>
    %cst_11 = arith.constant 0.000000e+00 : f32
    %35 = vector.broadcast %cst_11 : f32 to vector<10x8xf32>
    %36 = arith.select %34, %30, %35 : vector<10x8xi1>, vector<10x8xf32>
    %cst_12 = arith.constant dense<0.000000e+00> : vector<8xf32>
    %37 = vector.multi_reduction <add>, %36, %cst_12 [0] : vector<10x8xf32> to vector<8xf32>
    %38 = vector.shape_cast %37 : vector<8xf32> to vector<1x8xf32>
    %cst_13 = arith.constant dense<0.000000e+00> : vector<8xf32>
    %39 = vector.multi_reduction <add>, %30, %cst_13 [0] : vector<10x8xf32> to vector<8xf32>
    %40 = vector.shape_cast %39 : vector<8xf32> to vector<1x8xf32>
    %cst_14 = arith.constant 0.899999976 : f32
    %41 = vector.broadcast %cst_14 : f32 to vector<1x8xf32>
    %42 = arith.mulf %41, %38 : vector<1x8xf32>
    %cst_15 = arith.constant 0.00999999977 : f32
    %43 = vector.broadcast %cst_15 : f32 to vector<1x8xf32>
    %44 = arith.mulf %43, %40 : vector<1x8xf32>
    %45 = arith.addf %42, %44 : vector<1x8xf32>
    %cst_16 = arith.constant 1.000000e-07 : f32
    %46 = vector.broadcast %cst_16 : f32 to vector<1x8xf32>
    %47 = arith.maximumf %45, %46 : vector<1x8xf32>
    %48 = math.log %47 : vector<1x8xf32>
    %cst_17 = arith.constant 0.699999988 : f32
    %49 = vector.broadcast %cst_17 : f32 to vector<1x8xf32>
    %50 = arith.mulf %49, %48 : vector<1x8xf32>
    %51 = math.exp %50 : vector<1x8xf32>
    %cst_18 = arith.constant 1.000000e+00 : f32
    %52 = vector.broadcast %cst_18 : f32 to vector<1x8xf32>
    %53 = arith.subf %52, %51 : vector<1x8xf32>
    %cst_19 = arith.constant 0.699999988 : f32
    %54 = vector.broadcast %cst_19 : f32 to vector<1x8xf32>
    %55 = arith.divf %53, %54 : vector<1x8xf32>
    %cst_20 = arith.constant 0.000000e+00 : f32
    %56 = vector.broadcast %cst_20 : f32 to vector<1x8xf32>
    %57 = arith.select %10, %55, %56 : vector<1x8xi1>, vector<1x8xf32>
    %cst_21 = arith.constant 0.000000e+00 : f32
    %58 = vector.broadcast %cst_21 : f32 to vector<1x8xf32>
    %cst_22 = arith.constant dense<0xFF800000> : vector<8xf32>
    %59 = vector.multi_reduction <maximumf>, %30, %cst_22 [0] : vector<10x8xf32> to vector<8xf32>
    %60 = vector.shape_cast %59 : vector<8xf32> to vector<1x8xf32>
    %61 = arith.addf %58, %60 : vector<1x8xf32>
    %62 = vector.broadcast %60 : vector<1x8xf32> to vector<10x8xf32>
    %63 = arith.cmpf oge, %30, %62 : vector<10x8xf32>
    %c10_i32 = arith.constant 10 : i32
    %64 = vector.broadcast %c10_i32 : i32 to vector<10x8xi32>
    %65 = arith.select %63, %31, %64 : vector<10x8xi1>, vector<10x8xi32>
    %cst_23 = arith.constant dense<2147483647> : vector<8xi32>
    %66 = vector.multi_reduction <minsi>, %65, %cst_23 [0] : vector<10x8xi32> to vector<8xi32>
    %67 = vector.shape_cast %66 : vector<8xi32> to vector<1x8xi32>
    %68 = vector.broadcast %67 : vector<1x8xi32> to vector<10x8xi32>
    %69 = arith.cmpi eq, %31, %68 : vector<10x8xi32>
    %cst_24 = arith.constant -1.000000e+00 : f32
    %70 = vector.broadcast %cst_24 : f32 to vector<10x8xf32>
    %71 = arith.select %69, %70, %30 : vector<10x8xi1>, vector<10x8xf32>
    %cst_25 = arith.constant dense<0xFF800000> : vector<8xf32>
    %72 = vector.multi_reduction <maximumf>, %71, %cst_25 [0] : vector<10x8xf32> to vector<8xf32>
    %73 = vector.shape_cast %72 : vector<8xf32> to vector<1x8xf32>
    %74 = arith.addf %61, %73 : vector<1x8xf32>
    %cst_26 = arith.constant 2.000000e+00 : f32
    %75 = vector.broadcast %cst_26 : f32 to vector<1x8xf32>
    %76 = arith.subf %75, %74 : vector<1x8xf32>
    %cst_27 = arith.constant 5.000000e-01 : f32
    %77 = vector.broadcast %cst_27 : f32 to vector<1x8xf32>
    %78 = arith.cmpf olt, %76, %77 : vector<1x8xf32>
    %79 = arith.andi %78, %10 : vector<1x8xi1>
    %c0_28 = arith.constant 0 : index
    %80 = memref.load %arg5[%c0_28] : memref<3xf32, #tpu.memory_space<smem>>
    %81 = vector.shape_cast %57 : vector<1x8xf32> to vector<1x1x8xf32>
    %cst_29 = arith.constant dense<0.000000e+00> : vector<1xf32>
    %82 = vector.multi_reduction <add>, %81, %cst_29 [1, 2] : vector<1x1x8xf32> to vector<1xf32>
    %83 = vector.shape_cast %82 : vector<1xf32> to vector<1x1x1xf32>
    %84 = vector.extract %83[0, 0, 0] : f32 from vector<1x1x1xf32>
    %85 = arith.addf %80, %84 : f32
    %c0_30 = arith.constant 0 : index
    %86 = memref.load %arg5[%c0_30] : memref<3xf32, #tpu.memory_space<smem>>
    memref.store %85, %arg5[%c0_30] : memref<3xf32, #tpu.memory_space<smem>>
    %c1 = arith.constant 1 : index
    %87 = memref.load %arg5[%c1] : memref<3xf32, #tpu.memory_space<smem>>
    %cst_31 = arith.constant 0.000000e+00 : f32
    %88 = vector.broadcast %cst_31 : f32 to vector<1x8xf32>
    %89 = arith.select %79, %76, %88 : vector<1x8xi1>, vector<1x8xf32>
    %90 = vector.shape_cast %89 : vector<1x8xf32> to vector<1x1x8xf32>
    %cst_32 = arith.constant dense<0.000000e+00> : vector<1xf32>
    %91 = vector.multi_reduction <add>, %90, %cst_32 [1, 2] : vector<1x1x8xf32> to vector<1xf32>
    %92 = vector.shape_cast %91 : vector<1xf32> to vector<1x1x1xf32>
    %93 = vector.extract %92[0, 0, 0] : f32 from vector<1x1x1xf32>
    %94 = arith.addf %87, %93 : f32
    %c1_33 = arith.constant 1 : index
    %95 = memref.load %arg5[%c1_33] : memref<3xf32, #tpu.memory_space<smem>>
    memref.store %94, %arg5[%c1_33] : memref<3xf32, #tpu.memory_space<smem>>
    %c2 = arith.constant 2 : index
    %96 = memref.load %arg5[%c2] : memref<3xf32, #tpu.memory_space<smem>>
    %cst_34 = arith.constant 1.000000e+00 : f32
    %cst_35 = arith.constant 0.000000e+00 : f32
    %97 = vector.broadcast %cst_34 : f32 to vector<1x8xf32>
    %98 = vector.broadcast %cst_35 : f32 to vector<1x8xf32>
    %99 = arith.select %79, %97, %98 : vector<1x8xi1>, vector<1x8xf32>
    %100 = vector.shape_cast %99 : vector<1x8xf32> to vector<1x1x8xf32>
    %cst_36 = arith.constant dense<0.000000e+00> : vector<1xf32>
    %101 = vector.multi_reduction <add>, %100, %cst_36 [1, 2] : vector<1x1x8xf32> to vector<1xf32>
    %102 = vector.shape_cast %101 : vector<1xf32> to vector<1x1x1xf32>
    %103 = vector.extract %102[0, 0, 0] : f32 from vector<1x1x1xf32>
    %104 = arith.addf %96, %103 : f32
    %c2_37 = arith.constant 2 : index
    %105 = memref.load %arg5[%c2_37] : memref<3xf32, #tpu.memory_space<smem>>
    memref.store %104, %arg5[%c2_37] : memref<3xf32, #tpu.memory_space<smem>>
    %c0_i32_38 = arith.constant 0 : i32
    %106 = arith.cmpi eq, %arg1, %c0_i32_38 : i32
    %107 = arith.extui %106 : i1 to i32
    %c0_i32_39 = arith.constant 0 : i32
    %108 = arith.cmpi ne, %107, %c0_i32_39 : i32
    scf.if %108 {
      %109 = tpu.iota {dimensions = array<i32: 1>} : vector<8x128xi32>
      %c0_i32_40 = arith.constant 0 : i32
      %110 = vector.broadcast %c0_i32_40 : i32 to vector<8x128xi32>
      %111 = arith.cmpi eq, %109, %110 : vector<8x128xi32>
      %c0_41 = arith.constant 0 : index
      %112 = memref.load %arg5[%c0_41] : memref<3xf32, #tpu.memory_space<smem>>
      %c1_i32_42 = arith.constant 1 : i32
      %113 = vector.broadcast %c1_i32_42 : i32 to vector<8x128xi32>
      %114 = arith.cmpi eq, %109, %113 : vector<8x128xi32>
      %c1_43 = arith.constant 1 : index
      %115 = memref.load %arg5[%c1_43] : memref<3xf32, #tpu.memory_space<smem>>
      %c2_i32 = arith.constant 2 : i32
      %116 = vector.broadcast %c2_i32 : i32 to vector<8x128xi32>
      %117 = arith.cmpi eq, %109, %116 : vector<8x128xi32>
      %c2_44 = arith.constant 2 : index
      %118 = memref.load %arg5[%c2_44] : memref<3xf32, #tpu.memory_space<smem>>
      %cst_45 = arith.constant 0.000000e+00 : f32
      %119 = vector.broadcast %118 : f32 to vector<8x128xf32>
      %120 = vector.broadcast %cst_45 : f32 to vector<8x128xf32>
      %121 = arith.select %117, %119, %120 : vector<8x128xi1>, vector<8x128xf32>
      %122 = vector.broadcast %115 : f32 to vector<8x128xf32>
      %123 = arith.select %114, %122, %121 : vector<8x128xi1>, vector<8x128xf32>
      %124 = vector.broadcast %112 : f32 to vector<8x128xf32>
      %125 = arith.select %111, %124, %123 : vector<8x128xi1>, vector<8x128xf32>
      %c0_46 = arith.constant 0 : index
      %c0_47 = arith.constant 0 : index
      %126 = vector.load %arg4[%c0_46, %c0_47] : memref<8x128xf32, #tpu.memory_space<vmem>>, vector<8x128xf32>
      tpu.vector_store %arg4[%c0_46, %c0_47], %125 {strides = array<i32>} : memref<8x128xf32, #tpu.memory_space<vmem>>, vector<8x128xf32>,
    } else {
    }
    return
  }
  func.func @transform_0(%arg0: i32, %arg1: i32) -> (i32, i32) {
    %c1_i32 = arith.constant 1 : i32
    %0 = arith.muli %arg0, %c1_i32 : i32
    %1 = arith.addi %0, %arg1 : i32
    %c0_i32 = arith.constant 0 : i32
    %2 = arith.minsi %1, %c0_i32 : i32
    %c0_i32_0 = arith.constant 0 : i32
    %c0_i32_1 = arith.constant 0 : i32
    return %c0_i32_0, %2 : i32, i32
  }
  func.func @transform_1(%arg0: i32, %arg1: i32) -> (i32, i32) {
    %c1_i32 = arith.constant 1 : i32
    %0 = arith.muli %arg0, %c1_i32 : i32
    %1 = arith.addi %0, %arg1 : i32
    %c0_i32 = arith.constant 0 : i32
    %2 = arith.minsi %1, %c0_i32 : i32
    %c0_i32_0 = arith.constant 0 : i32
    %c0_i32_1 = arith.constant 0 : i32
    return %c0_i32_0, %2 : i32, i32
  }
  func.func @transform_2(%arg0: i32, %arg1: i32) -> (i32, i32) {
    %c0_i32 = arith.constant 0 : i32
    %c0_i32_0 = arith.constant 0 : i32
    return %arg0, %c0_i32 : i32, i32
  }
}

</mosaic_0001>

<bundles_post_ra>
// kernel: tpu_custom_call.1
= control target key start
LH: loop header
LB: loop body
LE: loop exit
PB: predicated region body
PF: predicated region fallthrough
CT: control target
= control target key end

     0   :  { %vm86_vm0 = vcmask 64512   ;;  %vm88_vm1 = vcmask 58368   ;;  %s440_s0 = inlined_call_operand.vmem [shape: f32[10,8], index: 0, kind: input, shape index: {}]   ;;  %s441_s1 = inlined_call_operand.vmem [shape: s32[1,8], index: 1, kind: input, shape index: {}]   ;;  %s442_s2 = inlined_call_operand.hbm [shape: f32[8,128], index: 2, kind: output, shape index: {}]  }
   0x1   :  { %v80_v0 = vld [vmem:[%s440_s0] sm:$0xff]  ;;  %v81_v1 = vld [vmem:[%s440_s0 + $0x8] sm:$0x3] }
   0x2   :  { %v309_v2 = vclamps-f32 %v80_v0, 15.0  ;;  %v310_v3 = vclamps-f32 %v81_v1, 15.0 }
   0x3   :  { %7 = vsyncpa [#allocation4], 0  ;;  %v73_v30 = vlaneseq  ;;  %v324_v41 = vld [vmem:[%s441_s1] ss:$0 sm:$0xff]  ;;  %s365_s15 = smov [#allocation3]   ;;  %s291_s20 = sshll.u32 %s442_s2, 4  ;;  %s292_s20 = int_to_ptr.hbm [resolvable:$true] %s291_s20 }
   0x4   :  { %v87_v4 = vsel %vm86_vm0, %v309_v2, -inf  ;;  %v89_v5 = vsel %vm88_vm1, %v310_v3, -inf  ;;  %s289_s16 = sshll.u32 %s365_s15, 4  ;;  %s290_s16 = int_to_ptr.vmem [resolvable:$true] %s289_s16 }
   0x5   :  { %v90_v6 = vmax.f32 %v87_v4, %v89_v5  ;;  %v392_v36 = vshrl.u32 %v73_v30, 7 }
   0x7   :  { %v91_v7 = vrot.slane %v90_v6, 4  ;;  %v395_v40 = vadd.s32 8, %v392_v36  ;;  %vm138_vm6 = vcmp.eq.s32.totalorder %v392_v36, %v324_v41 }
   0x9   :  { %v92_v8 = vmax.f32 %v90_v6, %v91_v7  ;;  %vm139_vm7 = vcmp.eq.s32.totalorder %v395_v40, %v324_v41 }
   0xb   :  { %v93_v9 = vrot.slane %v92_v8, 2 }
   0xd   :  { %v94_v10 = vmax.f32 %v92_v8, %v93_v9 }
   0xf   :  { %v95_v11 = vrot.slane %v94_v10, 1 }
  0x11   :  { %v96_v12 = vmax.f32 %v94_v10, %v95_v11 }
  0x13   :  { %v97_v13 = vsub.f32 %v309_v2, %v96_v12  ;;  %v98_v14 = vsub.f32 %v310_v3, %v96_v12 }
  0x15   :  { %v99_v15 = vmul.f32 1.442695, %v97_v13  ;;  %v101_v16 = vmul.f32 1.442695, %v98_v14 }
  0x17   :  { %325 = vpow2.f32 %v99_v15  ;;  %v363_v15 = vmov 0.7  }
  0x18   :  { %327 = vpow2.f32 %v101_v16 }
  0x1d   :  { %v326_v17 = vpop.eup %325 }
  0x1e   :  { %v328_v18 = vpop.eup %327  ;;  %v103_v19 = vsel %vm86_vm0, %v326_v17, 0.0 }
  0x1f   :  { %v104_v20 = vsel %vm88_vm1, %v328_v18, 0.0 }
  0x20   :  { %v105_v21 = vadd.f32 %v104_v20, %v103_v19 }
  0x22   :  { %v106_v22 = vrot.slane %v105_v21, 4 }
  0x24   :  { %v107_v23 = vadd.f32 %v106_v22, %v105_v21 }
  0x26   :  { %v108_v24 = vrot.slane %v107_v23, 2 }
  0x28   :  { %v109_v25 = vadd.f32 %v108_v24, %v107_v23 }
  0x2a   :  { %v110_v26 = vrot.slane %v109_v25, 1 }
  0x2c   :  { %v111_v27 = vadd.f32 %v110_v26, %v109_v25 }
  0x2e   :  { %329 = vrcp.f32 %v111_v27  ;;  %v123_v31 = vand.u32 2147483648, %v111_v27  ;;  %vm117_vm2 = vweird.f32 %v111_v27  ;;  %v121_v33 = vand.u32 2147483647, %v111_v27 }
  0x2f   :  { %331 = vrcp.f32 %v363_v15 }
  0x30   :  { %v124_v35 = vor.u32 1.1754944e-38, %v123_v31  ;;  %vm122_vm5 = vcmp.eq.f32.partialorder %v121_v33, 8.507059e+37 }
  0x34   :  { %v330_v28 = vpop.eup %329 }
  0x35   :  { %v113_v29 = vmul.f32 %v330_v28, %v111_v27  ;;  %vm118_vm3 = vweird.f32 %v330_v28  ;;  %v332_v23 = vpop.eup %331 }
  0x36   :  { %vm119_vm4 = vmor %vm117_vm2, %vm118_vm3  ;;  %v171_v25 = vmul.f32 0.7, %v332_v23  ;;  %vm175_vm2 = vweird.f32 %v332_v23 }
  0x37   :  { %v114_v32 = vsub.f32 1.0, %v113_v29 }
  0x38   :  { %v172_v31 = vsub.f32 1.0, %v171_v25 }
  0x39   :  { %v115_v34 = vmul.f32 %v330_v28, %v114_v32 }
  0x3b   :  { %v116_v37 = vadd.f32 %v330_v28, %v115_v34 }
  0x3d   :  { %v120_v38 = vsel %vm119_vm4, %v330_v28, %v116_v37  ;;  %v173_v37 = vmul.f32 %v332_v23, %v172_v31  ;;  %vm224_vm4 = vcmask 57344  }
  0x3e   :  { %v125_v39 = vsel %vm122_vm5, %v124_v35, %v120_v38 }
  0x3f   :  { %v127_v42 = vmul.f32 %v326_v17, %v125_v39  ;;  %v128_v43 = vmul.f32 %v328_v18, %v125_v39 }
  0x41   :  { %v129_v44 = vmax.f32 %v127_v42, 1e-07  ;;  %v130_v45 = vmax.f32 %v128_v43, 1e-07 }
  0x43   :  { %v402_v46 = vmin.f32 %v129_v44, 1.0  ;;  %v404_v47 = vmin.f32 %v130_v45, 1.0  ;;  %v174_v44 = vadd.f32 %v332_v23, %v173_v37 }
  0x45   :  { %v140_v48 = vsel %vm138_vm6, %v402_v46, 0.0  ;;  %v141_v49 = vsel %vm139_vm7, %v404_v47, 0.0  ;;  %v151_v50 = vsel %vm86_vm0, %v402_v46, 0.0  ;;  %v152_v51 = vsel %vm88_vm1, %v404_v47, 0.0 }
  0x46   :  { %v142_v52 = vsel %vm86_vm0, %v140_v48, 0.0  ;;  %v143_v53 = vsel %vm88_vm1, %v141_v49, 0.0  ;;  %v153_v54 = vadd.f32 %v152_v51, %v151_v50  ;;  %v179_v55 = vsel %vm86_vm0, %v402_v46, -inf }
  0x47   :  { %v144_v56 = vadd.f32 %v143_v53, %v142_v52  ;;  %v180_v57 = vsel %vm88_vm1, %v404_v47, -inf  ;;  %v431_v48 = vand.u32 127, %v73_v30  ;;  %v364_v30 = vmov 0.0  }
  0x48   :  { %v154_v58 = vrot.slane %v153_v54, 4  ;;  %v181_v59 = vmax.f32 %v179_v55, %v180_v57 }
  0x49   :  { %v145_v60 = vrot.slane %v144_v56, 4  ;;  %vm79_vm3 = vcmp.lt.s32.totalorder %v431_v48, 8  ;;  %vm275_vm5 = vcmp.eq.s32.totalorder %v431_v48, 2  ;;  %vm273_vm6 = vcmp.eq.s32.totalorder %v431_v48, 1 }
  0x4a   :  { %v155_v61 = vadd.f32 %v154_v58, %v153_v54  ;;  %v182_v62 = vrot.slane %v181_v59, 4  ;;  %vm271_vm7 = vcmp.eq.s32.totalorder %v431_v48, 0 }
  0x4b   :  { %v146_v63 = vadd.f32 %v145_v60, %v144_v56 }
  0x4c   :  { %v156_v0 = vrot.slane %v155_v61, 2  ;;  %v183_v1 = vmax.f32 %v181_v59, %v182_v62 }
  0x4d   :  { %v147_v2 = vrot.slane %v146_v63, 2 }
  0x4e   :  { %v157_v3 = vadd.f32 %v156_v0, %v155_v61  ;;  %v184_v4 = vrot.slane %v183_v1, 2 }
  0x4f   :  { %v148_v5 = vadd.f32 %v147_v2, %v146_v63 }
  0x50   :  { %v158_v6 = vrot.slane %v157_v3, 1  ;;  %v185_v7 = vmax.f32 %v183_v1, %v184_v4 }
  0x51   :  { %v149_v8 = vrot.slane %v148_v5, 1 }
  0x52   :  { %v159_v9 = vadd.f32 %v158_v6, %v157_v3  ;;  %v186_v10 = vrot.slane %v185_v7, 1 }
  0x53   :  { %v150_v11 = vadd.f32 %v149_v8, %v148_v5 }
  0x54   :  { %v161_v12 = vmul.f32 0.01, %v159_v9  ;;  %v187_v13 = vmax.f32 %v185_v7, %v186_v10 }
  0x55   :  { %v160_v14 = vmul.f32 0.9, %v150_v11 }
  0x56   :  { %vm189_vm8 = vcmp.ge.f32.partialorder %v402_v46, %v187_v13  ;;  %vm190_vm9 = vcmp.ge.f32.partialorder %v404_v47, %v187_v13 }
  0x57   :  { %v162_v16 = vadd.f32 %v161_v12, %v160_v14  ;;  %v191_v17 = vsel %vm189_vm8, %v392_v36, 10  ;;  %v192_v18 = vsel %vm190_vm9, %v395_v40, 10 }
  0x58   :  { %v193_v19 = vsel %vm86_vm0, %v191_v17, 2147483647  ;;  %v194_v20 = vsel %vm88_vm1, %v192_v18, 2147483647 }
  0x59   :  { %v163_v21 = vmax.f32 %v162_v16, 1e-07  ;;  %vm195_vm10 = vcmp.lt.s32.totalorder %v193_v19, %v194_v20 }
  0x5a   :  { %v196_v22 = vsel %vm195_vm10, %v193_v19, %v194_v20 }
  0x5b   :  { %333 = vlog2.f32 %v163_v21  ;;  %v197_v24 = vrot.slane %v196_v22, 4 }
  0x5d   :  { %vm198_vm11 = vcmp.lt.s32.totalorder %v196_v22, %v197_v24 }
  0x5e   :  { %v199_v26 = vsel %vm198_vm11, %v196_v22, %v197_v24 }
  0x5f   :  { %v200_v27 = vrot.slane %v199_v26, 2 }
  0x61   :  { %v334_v28 = vpop.eup %333  ;;  %vm201_vm12 = vcmp.lt.s32.totalorder %v199_v26, %v200_v27 }
  0x62   :  { %v165_v29 = vmul.f32 0.6931472, %v334_v28  ;;  %v202_v32 = vsel %vm201_vm12, %v199_v26, %v200_v27 }
  0x63   :  { %v203_v33 = vrot.slane %v202_v32, 1 }
  0x64   :  { %v166_v34 = vmul.f32 0.7, %v165_v29 }
  0x65   :  { %vm204_vm13 = vcmp.lt.s32.totalorder %v202_v32, %v203_v33 }
  0x66   :  { %v167_v35 = vmul.f32 1.442695, %v166_v34  ;;  %v205_v38 = vsel %vm204_vm13, %v202_v32, %v203_v33 }
  0x67   :  { %vm206_vm14 = vcmp.eq.s32.totalorder %v392_v36, %v205_v38  ;;  %vm207_vm15 = vcmp.eq.s32.totalorder %v395_v40, %v205_v38  ;;  %v176_v36 = vsel %vm175_vm2, %v332_v23, %v174_v44 }
  0x68   :  { %335 = vpow2.f32 %v167_v35  ;;  %v208_v39 = vsel %vm206_vm14, -1.0, %v402_v46  ;;  %v209_v41 = vsel %vm207_vm15, -1.0, %v404_v47 }
  0x69   :  { %v210_v42 = vsel %vm86_vm0, %v208_v39, -inf  ;;  %v211_v43 = vsel %vm88_vm1, %v209_v41, -inf }
  0x6a   :  { %v212_v45 = vmax.f32 %v210_v42, %v211_v43 }
  0x6c   :  { %v213_v49 = vrot.slane %v212_v45, 4 }
  0x6e   :  { %v336_v50 = vpop.eup %335  ;;  %v214_v51 = vmax.f32 %v212_v45, %v213_v49 }
  0x6f   :  { %v169_v40 = vsub.f32 1.0, %v336_v50 }
  0x70   :  { %v215_v46 = vrot.slane %v214_v51, 2 }
  0x71   :  { %v177_v52 = vmul.f32 %v176_v36, %v169_v40 }
  0x72   :  { %v216_v47 = vmax.f32 %v214_v51, %v215_v46 }
  0x73   :  { %v178_v53 = vsel %vm79_vm3, %v177_v52, 0.0 }
  0x74   :  { %v225_v54 = vsel %vm224_vm4, %v178_v53, 0.0  ;;  %v217_v55 = vrot.slane %v216_v47, 1 }
  0x75   :  { %226 = vadd.xlane.f32.xlu0 %v225_v54 }
  0x76   :  { %v218_v56 = vmax.f32 %v216_v47, %v217_v55 }
  0x78   :  { %v219_v57 = vadd.f32 %v218_v56, %v187_v13 }
  0x7a   :  { %v220_v58 = vsub.f32 2.0, %v219_v57 }
  0x7c   :  { %vm221_vm0 = vcmp.lt.f32.partialorder %v220_v58, 0.5 }
  0x7d   :  { %vm222_vm1 = vmand %vm221_vm0, %vm79_vm3 }
  0x7e   :  { %v254_v59 = vsel %vm222_vm1, 1.0, %v364_v30  ;;  %v239_v60 = vsel %vm222_vm1, %v220_v58, 0.0 }
  0x7f   :  { %v255_v61 = vsel %vm224_vm4, %v254_v59, 0.0  ;;  %v240_v62 = vsel %vm224_vm4, %v239_v60, 0.0 }
  0x80   :  { %256 = vadd.xlane.f32.xlu1 %v255_v61  ;;  %241 = vadd.xlane.f32.xlu0 %v240_v62 }
  0xe8   :  { %v227_v63 = vpop.xlane.xlu0 %226 }
  0xe9   :  { %v228_v0 = vrot.slane %v227_v63, 4 }
  0xeb   :  { %v229_v1 = vadd.f32 %v228_v0, %v227_v63 }
  0xed   :  { %v230_v2 = vrot.slane %v229_v1, 2 }
  0xef   :  { %v231_v3 = vadd.f32 %v230_v2, %v229_v1 }
  0xf1   :  { %v232_v4 = vrot.slane %v231_v3, 1 }
  0xf3   :  { %v257_v5 = vpop.xlane.xlu1 %256  ;;  %v242_v6 = vpop.xlane.xlu0 %241  ;;  %v233_v7 = vadd.f32 %v232_v4, %v231_v3 }
  0xf4   :  { %v258_v8 = vrot.slane %v257_v5, 4  ;;  %v243_v9 = vrot.slane %v242_v6, 4 }
  0xf5   :  { %315 = vpush %v233_v7 }
  0xf6   :  { %v259_v10 = vadd.f32 %v258_v8, %v257_v5  ;;  %v244_v11 = vadd.f32 %v243_v9, %v242_v6 }
  0xf8   :  { %v260_v12 = vrot.slane %v259_v10, 2  ;;  %v245_v13 = vrot.slane %v244_v11, 2 }
  0xfa   :  { %v261_v14 = vadd.f32 %v260_v12, %v259_v10  ;;  %v246_v15 = vadd.f32 %v245_v13, %v244_v11 }
  0xfc   :  { %v247_v16 = vrot.slane %v246_v15, 1  ;;  %v262_v17 = vrot.slane %v261_v14, 1 }
  0xfe   :  { %v248_v18 = vadd.f32 %v247_v16, %v246_v15  ;;  %v263_v19 = vadd.f32 %v262_v17, %v261_v14 }
 0x100   :  { %317 = vpush %v248_v18 }
 0x101   :  { %319 = vpush %v263_v19 }
 0x126   :  { %s316_s1 = spop %315 }
 0x127   :  { %v281_v23 = vstv %s316_s1 }
 0x131   :  { %s318_s14 = spop %317 }
 0x132   :  { %v279_v20 = vstv %s318_s14  ;;  %s320_s17 = spop %319 }
 0x133   :  { %v277_v21 = vstv %s320_s17 }
 0x134   :  { %v278_v22 = vsel %vm275_vm5, %v277_v21, 0.0 }
 0x135   :  { %v280_v24 = vsel %vm273_vm6, %v279_v20, %v278_v22 }
 0x136   :  { %v282_v25 = vsel %vm271_vm7, %v281_v23, %v280_v24 }
 0x137   :  { %283 = vst [vmem:[#allocation3] sm:$0xff] %v282_v25 }
 0x138   :  { %294 = dma.vmem_to_hbm [thread:$0]  %s290_s16, 128, %s292_s20, [#allocation4]  }
 0x139   :  { %361 = dma.done.wait [#allocation4], 128  }
 0x13a   :  { %362 = vsyncadd [#allocation4], 4294967168 }
 0x13b   :  { %299 = vsyncpa [#allocation4], 1 }

</bundles_post_ra>
